<compile_context>
chip_gen: v7x
topology: tpu7x:2x2x1
jax: 0.10.0
libtpu: 0.0.40
codegen_flags: <defaults>
</compile_context>

<pallas_src>
import numpy as np
import jax
import jax.numpy as jnp
from jax.experimental import pallas as pl
from jax.experimental.pallas import tpu as pltpu

# --- ConfigTrans values used by the forward pass ---
EMBED = 128          # config.embed
DIM_MODEL = 128      # config.dim_model
PAD_SIZE = 1         # config.pad_size (= sequence length)
NUM_HEAD = 8         # config.num_head
DIM_HEAD = DIM_MODEL // NUM_HEAD
LN_EPS = 1e-5        # torch.nn.LayerNorm default eps


def encoder_kernel(x_ref, pe_ref, wv_ref, bv_ref, wo_ref, bo_ref,
                   gamma_ref, beta_ref, out_ref):
    """One (TB, 128) row tile: PE add, V proj, out proj, residual, LayerNorm.

    pad_size == 1  =>  softmax over the single key is exactly 1, so the
    attention context equals V.  Q/K projections and per-head reshapes are
    dead work and intentionally omitted (verified against the full reference).
    """
    h = x_ref[...] + pe_ref[...]                                    # (TB, E)

    # V projection and output projection (torch Linear: y = x @ W^T + b)
    v = jnp.dot(h, wv_ref[...], preferred_element_type=jnp.float32) + bv_ref[...]
    o = jnp.dot(v, wo_ref[...], preferred_element_type=jnp.float32) + bo_ref[...]

    # Residual (dropout is identity in eval mode) + LayerNorm
    o = o + h
    mu = jnp.mean(o, axis=-1, keepdims=True)
    var = jnp.mean((o - mu) ** 2, axis=-1, keepdims=True)
    xhat = (o - mu) * jax.lax.rsqrt(var + LN_EPS)
    out_ref[...] = xhat * gamma_ref[...] + beta_ref[...]


def _round_up(n, m):
    return -(-n // m) * m


def _choose_row_tile(rows):
    """Multiple-of-8 row tile in [8, 512]; prefer >= 2 grid steps (v7x: 2 TCs)."""
    tb = min(512, _round_up(max(rows, 8), 8))
    if rows > 8 and _round_up(rows, tb) // tb < 2:
        tb = min(tb, _round_up(-(-rows // 2), 8))   # split for both TensorCores
    return tb


def transformer_forward(x, params):
    """x: (B, S, E) float32.  Returns (B, S*E) as in Transformer_test.forward."""
    B, S, E = x.shape
    assert S == PAD_SIZE and E == EMBED
    pe, wvt, bv, wot, bo, gamma, beta = params

    # Fold batch (and seq, S == 1) rows into the matmul M dimension.
    rows = B * S
    tb = _choose_row_tile(rows)
    rows_p = _round_up(rows, tb)
    x2 = x.reshape(rows, E)
    if rows_p != rows:
        x2 = jnp.concatenate(
            [x2, jnp.zeros((rows_p - rows, E), x2.dtype)], axis=0)

    row_spec = pl.BlockSpec((tb, E), lambda i: (i, 0))
    mat_spec = pl.BlockSpec((E, E), lambda i: (0, 0))
    vec_spec = pl.BlockSpec((1, E), lambda i: (0, 0))

    out = pl.pallas_call(
        encoder_kernel,
        out_shape=jax.ShapeDtypeStruct((rows_p, E), jnp.float32),
        grid=(rows_p // tb,),
        in_specs=[
            row_spec,             # x rows (TB, 128)
            vec_spec,             # positional encoding (S == 1 row, broadcast)
            mat_spec, vec_spec,   # Wv^T, bv
            mat_spec, vec_spec,   # Wo^T, bo
            vec_spec, vec_spec,   # LayerNorm gamma, beta
        ],
        out_specs=row_spec,
        compiler_params=pltpu.CompilerParams(
            dimension_semantics=("parallel",)),
    )(x2, pe, wvt, bv, wot, bo, gamma, beta)

    # out.view(out.size(0), -1)
    return out[:rows].reshape(B, S * E)


def make_positional_encoding(pad_size, embed):
    pos = np.arange(pad_size, dtype=np.float64)[:, None]
    i = np.arange(embed, dtype=np.float64)[None, :]
    angle = pos / np.power(10000.0, (i // 2) * 2.0 / embed)
    pe = np.empty((pad_size, embed), dtype=np.float32)
    pe[:, 0::2] = np.sin(angle[:, 0::2])
    pe[:, 1::2] = np.cos(angle[:, 1::2])
    return jnp.asarray(pe)


def init_params(key):
    """Deterministic parameter init (PyTorch-Linear-style uniform bounds).

    Returns the FULL parameter set (including Wq/Wk, which provably do not
    affect the S==1 output); the kernel consumes only the live subset.
    """
    def linear(k, in_dim, out_dim):
        kw, kb = jax.random.split(k)
        bound = 1.0 / np.sqrt(in_dim)
        w = jax.random.uniform(kw, (out_dim, in_dim), jnp.float32, -bound, bound)
        b = jax.random.uniform(kb, (1, out_dim), jnp.float32, -bound, bound)
        return w.T, b                        # pass W^T = (in, out) to the kernel

    kq, kk, kv, ko = jax.random.split(key, 4)
    wqt, bq = linear(kq, DIM_MODEL, DIM_MODEL)
    wkt, bk = linear(kk, DIM_MODEL, DIM_MODEL)
    wvt, bv = linear(kv, DIM_MODEL, DIM_MODEL)
    wot, bo = linear(ko, DIM_MODEL, DIM_MODEL)
    gamma = jnp.ones((1, DIM_MODEL), jnp.float32)
    beta = jnp.zeros((1, DIM_MODEL), jnp.float32)
    pe = make_positional_encoding(PAD_SIZE, EMBED)
    return dict(pe=pe, wqt=wqt, bq=bq, wkt=wkt, bk=bk, wvt=wvt, bv=bv,
                wot=wot, bo=bo, gamma=gamma, beta=beta)


def kernel_params(full):
    return (full['pe'], full['wvt'], full['bv'], full['wot'], full['bo'],
            full['gamma'], full['beta'])


def reference_forward(x, p):
    """Pure-JAX mirror of the FULL PyTorch forward (eval mode), incl. Q/K path."""
    B, S, E = x.shape
    hp = jax.lax.Precision.HIGHEST
    h = x + p['pe']
    q = jnp.matmul(h, p['wqt'], precision=hp) + p['bq']
    k = jnp.matmul(h, p['wkt'], precision=hp) + p['bk']
    v = jnp.matmul(h, p['wvt'], precision=hp) + p['bv']
    Q = q.reshape(B * NUM_HEAD, -1, DIM_HEAD)
    K = k.reshape(B * NUM_HEAD, -1, DIM_HEAD)
    V = v.reshape(B * NUM_HEAD, -1, DIM_HEAD)
    scale = DIM_HEAD ** (-0.5)
    attn = jnp.einsum('bqd,bkd->bqk', Q, K, precision=hp) * scale
    attn = jax.nn.softmax(attn, axis=-1)
    ctx = jnp.einsum('bqk,bkd->bqd', attn, V, precision=hp)
    ctx = ctx.reshape(B, -1, NUM_HEAD * DIM_HEAD)
    o = jnp.matmul(ctx, p['wot'], precision=hp) + p['bo']
    o = o + h
    mu = o.mean(-1, keepdims=True)
    var = ((o - mu) ** 2).mean(-1, keepdims=True)
    o = (o - mu) / jnp.sqrt(var + LN_EPS) * p['gamma'] + p['beta']
    return o.reshape(B, -1)


# TODO(synk): nn.Dropout(p=0.5) is modeled as identity (eval mode); stochastic
# train-mode dropout is not implemented.
# TODO(synk): the kernel is specialized for config.pad_size == 1 (as pinned by
# ConfigTrans); S > 1 would require reinstating the per-head attention path.

if __name__ == "__main__":
    key = jax.random.PRNGKey(0)
    kx1, kx2, kp = jax.random.split(key, 3)

    full = init_params(kp)
    kparams = kernel_params(full)

    # Small case (exercises row padding 2 -> 8) and a multi-tile case
    # (16 rows -> two (8,128) grid steps, both TensorCores on v7x).
    for kx, B in ((kx1, 2), (kx2, 16)):
        x = jax.random.normal(kx, (B, PAD_SIZE, EMBED), jnp.float32)
        out = jax.block_until_ready(transformer_forward(x, kparams))
        ref = reference_forward(x, full)
        np.testing.assert_allclose(np.asarray(out), np.asarray(ref),
                                   rtol=1e-3, atol=1e-3)
        assert out.shape == (B, PAD_SIZE * EMBED)

    print("KERNEL_OK")
</pallas_src>

<mosaic_0001>
module attributes {stable_mosaic.version = 11 : i64} {
  func.func @encoder_kernel(%arg0: i32, %arg1: memref<8x128xf32, #tpu.memory_space<vmem>>, %arg2: memref<1x128xf32, #tpu.memory_space<vmem>>, %arg3: memref<128x128xf32, #tpu.memory_space<vmem>>, %arg4: memref<1x128xf32, #tpu.memory_space<vmem>>, %arg5: memref<128x128xf32, #tpu.memory_space<vmem>>, %arg6: memref<1x128xf32, #tpu.memory_space<vmem>>, %arg7: memref<1x128xf32, #tpu.memory_space<vmem>>, %arg8: memref<1x128xf32, #tpu.memory_space<vmem>>, %arg9: memref<8x128xf32, #tpu.memory_space<vmem>>) attributes {dimension_semantics = [#tpu.dimension_semantics<parallel>], iteration_bounds = array<i64: 1>, scalar_prefetch = 0 : i64, scratch_operands = 0 : i64, tpu.core_type = #tpu.core_type<tc>, window_params = [{transform_indices = @transform_0, window_bounds = array<i64: 8, 128>}, {pipeline_mode = #tpu.pipeline_mode<synchronous>, transform_indices = @transform_1, window_bounds = array<i64: 1, 128>}, {pipeline_mode = #tpu.pipeline_mode<synchronous>, transform_indices = @transform_2, window_bounds = array<i64: 128, 128>}, {pipeline_mode = #tpu.pipeline_mode<synchronous>, transform_indices = @transform_3, window_bounds = array<i64: 1, 128>}, {pipeline_mode = #tpu.pipeline_mode<synchronous>, transform_indices = @transform_4, window_bounds = array<i64: 128, 128>}, {pipeline_mode = #tpu.pipeline_mode<synchronous>, transform_indices = @transform_5, window_bounds = array<i64: 1, 128>}, {pipeline_mode = #tpu.pipeline_mode<synchronous>, transform_indices = @transform_6, window_bounds = array<i64: 1, 128>}, {pipeline_mode = #tpu.pipeline_mode<synchronous>, transform_indices = @transform_7, window_bounds = array<i64: 1, 128>}, {transform_indices = @transform_8, window_bounds = array<i64: 8, 128>}]} {
    %c0 = arith.constant 0 : index
    %c0_0 = arith.constant 0 : index
    %0 = vector.load %arg1[%c0, %c0_0] : memref<8x128xf32, #tpu.memory_space<vmem>>, vector<8x128xf32>
    %c0_1 = arith.constant 0 : index
    %c0_2 = arith.constant 0 : index
    %1 = vector.load %arg2[%c0_1, %c0_2] : memref<1x128xf32, #tpu.memory_space<vmem>>, vector<1x128xf32>
    %2 = vector.broadcast %1 : vector<1x128xf32> to vector<8x128xf32>
    %3 = arith.addf %0, %2 : vector<8x128xf32>
    %c0_3 = arith.constant 0 : index
    %c0_4 = arith.constant 0 : index
    %4 = vector.load %arg3[%c0_3, %c0_4] : memref<128x128xf32, #tpu.memory_space<vmem>>, vector<128x128xf32>
    %cst = arith.constant dense<0.000000e+00> : vector<8x128xf32>
    %5 = tpu.matmul %3, %4, %cst {dimension_numbers = #tpu.dot_dimension_numbers<[1], [0], [0], [1], [0, 0, 1, 1], [], []>} : vector<8x128xf32>, vector<128x128xf32>, vector<8x128xf32> -> vector<8x128xf32>
    %c0_5 = arith.constant 0 : index
    %c0_6 = arith.constant 0 : index
    %6 = vector.load %arg4[%c0_5, %c0_6] : memref<1x128xf32, #tpu.memory_space<vmem>>, vector<1x128xf32>
    %7 = vector.broadcast %6 : vector<1x128xf32> to vector<8x128xf32>
    %8 = arith.addf %5, %7 : vector<8x128xf32>
    %c0_7 = arith.constant 0 : index
    %c0_8 = arith.constant 0 : index
    %9 = vector.load %arg5[%c0_7, %c0_8] : memref<128x128xf32, #tpu.memory_space<vmem>>, vector<128x128xf32>
    %cst_9 = arith.constant dense<0.000000e+00> : vector<8x128xf32>
    %10 = tpu.matmul %8, %9, %cst_9 {dimension_numbers = #tpu.dot_dimension_numbers<[1], [0], [0], [1], [0, 0, 1, 1], [], []>} : vector<8x128xf32>, vector<128x128xf32>, vector<8x128xf32> -> vector<8x128xf32>
    %c0_10 = arith.constant 0 : index
    %c0_11 = arith.constant 0 : index
    %11 = vector.load %arg6[%c0_10, %c0_11] : memref<1x128xf32, #tpu.memory_space<vmem>>, vector<1x128xf32>
    %12 = vector.broadcast %11 : vector<1x128xf32> to vector<8x128xf32>
    %13 = arith.addf %10, %12 : vector<8x128xf32>
    %14 = arith.addf %13, %3 : vector<8x128xf32>
    %cst_12 = arith.constant dense<0.000000e+00> : vector<8xf32>
    %15 = vector.multi_reduction <add>, %14, %cst_12 [1] : vector<8x128xf32> to vector<8xf32>
    %16 = vector.shape_cast %15 : vector<8xf32> to vector<8x1xf32>
    %cst_13 = arith.constant 1.280000e+02 : f32
    %17 = vector.broadcast %cst_13 : f32 to vector<8x1xf32>
    %18 = arith.divf %16, %17 : vector<8x1xf32>
    %19 = vector.broadcast %18 : vector<8x1xf32> to vector<8x128xf32>
    %20 = arith.subf %14, %19 : vector<8x128xf32>
    %21 = arith.mulf %20, %20 : vector<8x128xf32>
    %cst_14 = arith.constant dense<0.000000e+00> : vector<8xf32>
    %22 = vector.multi_reduction <add>, %21, %cst_14 [1] : vector<8x128xf32> to vector<8xf32>
    %23 = vector.shape_cast %22 : vector<8xf32> to vector<8x1xf32>
    %cst_15 = arith.constant 1.280000e+02 : f32
    %24 = vector.broadcast %cst_15 : f32 to vector<8x1xf32>
    %25 = arith.divf %23, %24 : vector<8x1xf32>
    %26 = vector.broadcast %18 : vector<8x1xf32> to vector<8x128xf32>
    %27 = arith.subf %14, %26 : vector<8x128xf32>
    %cst_16 = arith.constant 9.99999974E-6 : f32
    %28 = vector.broadcast %cst_16 : f32 to vector<8x1xf32>
    %29 = arith.addf %25, %28 : vector<8x1xf32>
    %30 = math.rsqrt %29 : vector<8x1xf32>
    %31 = vector.broadcast %30 : vector<8x1xf32> to vector<8x128xf32>
    %32 = arith.mulf %27, %31 : vector<8x128xf32>
    %c0_17 = arith.constant 0 : index
    %c0_18 = arith.constant 0 : index
    %33 = vector.load %arg7[%c0_17, %c0_18] : memref<1x128xf32, #tpu.memory_space<vmem>>, vector<1x128xf32>
    %34 = vector.broadcast %33 : vector<1x128xf32> to vector<8x128xf32>
    %35 = arith.mulf %32, %34 : vector<8x128xf32>
    %c0_19 = arith.constant 0 : index
    %c0_20 = arith.constant 0 : index
    %36 = vector.load %arg8[%c0_19, %c0_20] : memref<1x128xf32, #tpu.memory_space<vmem>>, vector<1x128xf32>
    %37 = vector.broadcast %36 : vector<1x128xf32> to vector<8x128xf32>
    %38 = arith.addf %35, %37 : vector<8x128xf32>
    %c0_21 = arith.constant 0 : index
    %c0_22 = arith.constant 0 : index
    %39 = vector.load %arg9[%c0_21, %c0_22] : memref<8x128xf32, #tpu.memory_space<vmem>>, vector<8x128xf32>
    tpu.vector_store %arg9[%c0_21, %c0_22], %38 {strides = array<i32>} : memref<8x128xf32, #tpu.memory_space<vmem>>, vector<8x128xf32>,
    return
  }
  func.func @transform_0(%arg0: i32) -> (i32, i32) {
    %c0_i32 = arith.constant 0 : i32
    %c0_i32_0 = arith.constant 0 : i32
    return %arg0, %c0_i32 : i32, i32
  }
  func.func @transform_1(%arg0: i32) -> (i32, i32) {
    %c0_i32 = arith.constant 0 : i32
    %c0_i32_0 = arith.constant 0 : i32
    %c0_i32_1 = arith.constant 0 : i32
    return %c0_i32, %c0_i32_0 : i32, i32
  }
  func.func @transform_2(%arg0: i32) -> (i32, i32) {
    %c0_i32 = arith.constant 0 : i32
    %c0_i32_0 = arith.constant 0 : i32
    %c0_i32_1 = arith.constant 0 : i32
    return %c0_i32, %c0_i32_0 : i32, i32
  }
  func.func @transform_3(%arg0: i32) -> (i32, i32) {
    %c0_i32 = arith.constant 0 : i32
    %c0_i32_0 = arith.constant 0 : i32
    %c0_i32_1 = arith.constant 0 : i32
    return %c0_i32, %c0_i32_0 : i32, i32
  }
  func.func @transform_4(%arg0: i32) -> (i32, i32) {
    %c0_i32 = arith.constant 0 : i32
    %c0_i32_0 = arith.constant 0 : i32
    %c0_i32_1 = arith.constant 0 : i32
    return %c0_i32, %c0_i32_0 : i32, i32
  }
  func.func @transform_5(%arg0: i32) -> (i32, i32) {
    %c0_i32 = arith.constant 0 : i32
    %c0_i32_0 = arith.constant 0 : i32
    %c0_i32_1 = arith.constant 0 : i32
    return %c0_i32, %c0_i32_0 : i32, i32
  }
  func.func @transform_6(%arg0: i32) -> (i32, i32) {
    %c0_i32 = arith.constant 0 : i32
    %c0_i32_0 = arith.constant 0 : i32
    %c0_i32_1 = arith.constant 0 : i32
    return %c0_i32, %c0_i32_0 : i32, i32
  }
  func.func @transform_7(%arg0: i32) -> (i32, i32) {
    %c0_i32 = arith.constant 0 : i32
    %c0_i32_0 = arith.constant 0 : i32
    %c0_i32_1 = arith.constant 0 : i32
    return %c0_i32, %c0_i32_0 : i32, i32
  }
  func.func @transform_8(%arg0: i32) -> (i32, i32) {
    %c0_i32 = arith.constant 0 : i32
    %c0_i32_0 = arith.constant 0 : i32
    return %arg0, %c0_i32 : i32, i32
  }
}

</mosaic_0001>

<bundles_post_ra>
// kernel: tpu_custom_call.1
= control target key start
LH: loop header
LB: loop body
LE: loop exit
PB: predicated region body
PF: predicated region fallthrough
CT: control target
= control target key end

     0   :  { %13 = vsyncpa [#allocation3], 0  ;;  %s711_s0 = inlined_call_operand.hbm [shape: f32[8,128], index: 0, kind: input, shape index: {}]   ;;  %s712_s1 = inlined_call_operand.vmem [shape: f32[1,128], index: 1, kind: input, shape index: {}]   ;;  %s713_s2 = inlined_call_operand.hbm [shape: f32[128,128], index: 2, kind: input, shape index: {}]   ;;  %s714_s3 = inlined_call_operand.vmem [shape: f32[1,128], index: 3, kind: input, shape index: {}]   ;;  %s715_s4 = inlined_call_operand.hbm [shape: f32[128,128], index: 4, kind: input, shape index: {}]   ;;  %s716_s5 = inlined_call_operand.vmem [shape: f32[1,128], index: 5, kind: input, shape index: {}]   ;;  %s717_s6 = inlined_call_operand.vmem [shape: f32[1,128], index: 6, kind: input, shape index: {}]   ;;  %s718_s7 = inlined_call_operand.vmem [shape: f32[1,128], index: 7, kind: input, shape index: {}]   ;;  %s719_s8 = inlined_call_operand.hbm [shape: f32[8,128], index: 8, kind: output, shape index: {}]  }
   0x1   :  { %14 = vsyncpa [#allocation6], 0 }
   0x2   :  { %15 = vsyncpa [#allocation4], 0  ;;  %s572_s27 = smov [#allocation5]   ;;  %s478_s9 = scalar_lea.hbm %s713_s2, 2048 }
   0x3   :  { %s33_s28 = sshll.u32 %s572_s27, 4  ;;  %p479_p0 = scmp.ne.s32.totalorder %s713_s2, %s478_s9  ;;  %s34_s28 = int_to_ptr.vmem [resolvable:$true] %s33_s28 }
   0x4   :  { %p482_p1 = scmp.lt.u32.totalorder %s478_s9, %s713_s2 }
   0x6   :  { %p484_p2 = pnand %p482_p1, %p479_p0 }
   0x8   :  { %487 = shalt.err (!%p484_p2)
}
   0x9   :  { %s488_s14 = scalar_lea.vmem %s34_s28, 2048  ;;  %p493_p4 = scmp.lt.s32.totalorder %s34_s28, %s34_s28 }
   0xa   :  { %p489_p3 = scmp.ne.s32.totalorder %s34_s28, %s488_s14  ;;  %p494_p5 = scmp.lt.s32.totalorder %s488_s14, %s488_s14 }
   0xc   :  { %p495_p6 = por %p494_p5, %p493_p4 }
   0xe   :  { %p496_p7 = pnand %p495_p6, %p489_p3 }
  0x10   :  { %499 = shalt.err (!%p496_p7)
}
  0x11   :  { %s573_s15 = smov 128   ;;  %s574_s16 = smov 8  }
  0x12   :  { %39 = dma.hbm_to_vmem [thread:$0]  %s713_s2, 2048, %s34_s28, [#allocation6], %s573_s15, %s573_s15, %s574_s16  }
  0x13   :  { %s575_s19 = smov [#allocation2]   ;;  %s576_s21 = smov [#allocation7]  }
  0x14   :  { %s22_s20 = sshll.u32 %s575_s19, 4  ;;  %s47_s22 = sshll.u32 %s576_s21, 4  ;;  %s23_s20 = int_to_ptr.vmem [resolvable:$true] %s22_s20  ;;  %s48_s22 = int_to_ptr.vmem [resolvable:$true] %s47_s22 }
  0x15   :  { %s500_s25 = scalar_lea.hbm %s711_s0, 128 }
  0x16   :  { %p501_p8 = scmp.ne.s32.totalorder %s711_s0, %s500_s25  ;;  %p504_p9 = scmp.lt.u32.totalorder %s500_s25, %s711_s0 }
  0x18   :  { %p506_p10 = pnand %p504_p9, %p501_p8 }
  0x1a   :  { %509 = shalt.err (!%p506_p10)
}
  0x1b   :  { %s510_s2 = scalar_lea.vmem %s23_s20, 128  ;;  %p515_p12 = scmp.lt.s32.totalorder %s23_s20, %s23_s20 }
  0x1c   :  { %p511_p11 = scmp.ne.s32.totalorder %s23_s20, %s510_s2  ;;  %p516_p13 = scmp.lt.s32.totalorder %s510_s2, %s510_s2 }
  0x1e   :  { %p517_p0 = por %p516_p13, %p515_p12 }
  0x20   :  { %p518_p1 = pnand %p517_p0, %p511_p11 }
  0x22   :  { %521 = shalt.err (!%p518_p1)
}
  0x23   :  { %25 = dma.hbm_to_vmem [thread:$0]  %s711_s0, 128, %s23_s20, [#allocation3]  }
  0x24   :  { %s522_s12 = scalar_lea.hbm %s715_s4, 2048 }
  0x25   :  { %p523_p2 = scmp.ne.s32.totalorder %s715_s4, %s522_s12  ;;  %p526_p3 = scmp.lt.u32.totalorder %s522_s12, %s715_s4 }
  0x27   :  { %p528_p4 = pnand %p526_p3, %p523_p2 }
  0x29   :  { %531 = shalt.err (!%p528_p4)
}
  0x2a   :  { %s532_s19 = scalar_lea.vmem %s48_s22, 2048  ;;  %p537_p6 = scmp.lt.s32.totalorder %s48_s22, %s48_s22 }
  0x2b   :  { %p533_p5 = scmp.ne.s32.totalorder %s48_s22, %s532_s19  ;;  %p538_p7 = scmp.lt.s32.totalorder %s532_s19, %s532_s19 }
  0x2d   :  { %p539_p8 = por %p538_p7, %p537_p6 }
  0x2f   :  { %p540_p9 = pnand %p539_p8, %p533_p5 }
  0x31   :  { %543 = shalt.err (!%p540_p9)
}
  0x32   :  { %53 = dma.hbm_to_vmem [thread:$0]  %s715_s4, 2048, %s48_s22, [#allocation6], %s573_s15, %s573_s15, %s574_s16  }
  0x33   :  { %566 = dma.done.wait [#allocation3], 128  }
  0x34   :  { %567 = vsyncadd [#allocation3], 4294967168 }
  0x35   :  { %568 = dma.done.wait [#allocation6], 4096  }
  0x36   :  { %569 = vsyncadd [#allocation6], 4294963200  ;;  %v577_v0 = vmov 0.0|0.0   ;;  %vm578_vm0 = vmmov 0   ;;  %v579_v1 = vmov 0.0   ;;  %v78_v2 = vld [vmem:[#allocation5] sm:$0xff] }
  0x37   :  { %419 = vmatprep.subr.bf16.mxu0 %v577_v0  ;;  %381 = vmatprep.mubr.msk.f32.mxu0 %vm578_vm0, %v579_v1  ;;  %v79_v3 = vld [vmem:[#allocation5 + $0x8] sm:$0xff]  ;;  %v80_v4 = vld [vmem:[#allocation5 + $0x10] sm:$0xff]  ;;  %v81_v6 = vld [vmem:[#allocation5 + $0x18] sm:$0xff]  ;;  %s580_s25 = smov [#allocation8]  }
  0x38   :  { %443 = vmatprep.subr.bf16.mxu1 %v577_v0  ;;  %416 = vmatprep.mubr.msk.f32.mxu1 %vm578_vm0, %v579_v1  ;;  %v420_v5 = vpack.c.bf16 %v79_v3, %v78_v2  ;;  %v423_v7 = vpack.c.bf16 %v81_v6, %v80_v4  ;;  %v82_v8 = vld [vmem:[#allocation5 + $0x20] sm:$0xff]  ;;  %v83_v9 = vld [vmem:[#allocation5 + $0x28] sm:$0xff]  ;;  %v173_v12 = vld [vmem:[#allocation7 + $0x10] sm:$0xff]  ;;  %s300_s26 = sshll.u32 %s580_s25, 4  ;;  %s301_s26 = int_to_ptr.vmem [resolvable:$true] %s300_s26 }
  0x39   :  { %v171_v10 = vld [vmem:[#allocation7] sm:$0xff]  ;;  %v172_v11 = vld [vmem:[#allocation7 + $0x8] sm:$0xff]  ;;  %v426_v13 = vpack.c.bf16 %v83_v9, %v82_v8  ;;  %v174_v15 = vld [vmem:[#allocation7 + $0x18] sm:$0xff]  ;;  %s544_s27 = scalar_lea.vmem %s301_s26, 128  ;;  %p549_p11 = scmp.lt.s32.totalorder %s301_s26, %s301_s26 }
  0x3a   :  { %421 = vmatpush3.bf16.msra.mxu0 %v420_v5  ;;  %v444_v14 = vpack.c.bf16 %v172_v11, %v171_v10  ;;  %v84_v16 = vld [vmem:[#allocation5 + $0x30] sm:$0xff]  ;;  %v85_v17 = vld [vmem:[#allocation5 + $0x38] sm:$0xff]  ;;  %v447_v18 = vpack.c.bf16 %v174_v15, %v173_v12  ;;  %v175_v19 = vld [vmem:[#allocation7 + $0x20] sm:$0xff]  ;;  %p545_p10 = scmp.ne.s32.totalorder %s301_s26, %s544_s27  ;;  %p550_p12 = scmp.lt.s32.totalorder %s544_s27, %s544_s27 }
  0x3b   :  { %422 = vmatprep.subr.bf16.mxu0 %v577_v0  ;;  %v176_v20 = vld [vmem:[#allocation7 + $0x28] sm:$0xff]  ;;  %v429_v21 = vpack.c.bf16 %v85_v17, %v84_v16  ;;  %v86_v22 = vld [vmem:[#allocation5 + $0x40] sm:$0xff]  ;;  %v177_v25 = vld [vmem:[#allocation7 + $0x30] sm:$0xff] }
  0x3c   :  { %445 = vmatpush3.bf16.msra.mxu1 %v444_v14  ;;  %v87_v23 = vld [vmem:[#allocation5 + $0x48] sm:$0xff]  ;;  %v450_v24 = vpack.c.bf16 %v176_v20, %v175_v19  ;;  %v178_v26 = vld [vmem:[#allocation7 + $0x38] sm:$0xff]  ;;  %v88_v28 = vld [vmem:[#allocation5 + $0x50] sm:$0xff]  ;;  %p551_p13 = por %p550_p12, %p549_p11 }
  0x3d   :  { %446 = vmatprep.subr.bf16.mxu1 %v577_v0  ;;  %v432_v27 = vpack.c.bf16 %v87_v23, %v86_v22  ;;  %v89_v29 = vld [vmem:[#allocation5 + $0x58] sm:$0xff]  ;;  %v453_v30 = vpack.c.bf16 %v178_v26, %v177_v25  ;;  %v179_v31 = vld [vmem:[#allocation7 + $0x40] sm:$0xff]  ;;  %v180_v32 = vld [vmem:[#allocation7 + $0x48] sm:$0xff] }
  0x3e   :  { %424 = vmatpush3.bf16.msra.mxu0 %v423_v7  ;;  %v435_v33 = vpack.c.bf16 %v89_v29, %v88_v28  ;;  %v90_v34 = vld [vmem:[#allocation5 + $0x60] sm:$0xff]  ;;  %v91_v35 = vld [vmem:[#allocation5 + $0x68] sm:$0xff]  ;;  %v456_v36 = vpack.c.bf16 %v180_v32, %v179_v31  ;;  %v181_v37 = vld [vmem:[#allocation7 + $0x50] sm:$0xff]  ;;  %p552_p0 = pnand %p551_p13, %p545_p10 }
  0x3f   :  { %425 = vmatprep.subr.bf16.mxu0 %v577_v0  ;;  %v182_v38 = vld [vmem:[#allocation7 + $0x58] sm:$0xff]  ;;  %v438_v39 = vpack.c.bf16 %v91_v35, %v90_v34  ;;  %v92_v40 = vld [vmem:[#allocation5 + $0x70] sm:$0xff]  ;;  %v183_v43 = vld [vmem:[#allocation7 + $0x60] sm:$0xff] }
  0x40   :  { %448 = vmatpush3.bf16.msra.mxu1 %v447_v18  ;;  %v93_v41 = vld [vmem:[#allocation5 + $0x78] sm:$0xff]  ;;  %v459_v42 = vpack.c.bf16 %v182_v38, %v181_v37  ;;  %v184_v44 = vld [vmem:[#allocation7 + $0x68] sm:$0xff]  ;;  %v185_v50 = vld [vmem:[#allocation7 + $0x70] sm:$0xff] }
  0x41   :  { %449 = vmatprep.subr.bf16.mxu1 %v577_v0  ;;  %v441_v45 = vpack.c.bf16 %v93_v41, %v92_v40  ;;  %v69_v46 = vld [vmem:[#allocation2] sm:$0xff]  ;;  %v462_v48 = vpack.c.bf16 %v184_v44, %v183_v43 }
  0x42   :  { %427 = vmatpush3.bf16.msra.mxu0 %v426_v13  ;;  %v310_v47 = vld [vmem:[%s712_s1] ss:$0 sm:$0xff] }
  0x43   :  { %428 = vmatprep.subr.bf16.mxu0 %v577_v0  ;;  %v77_v49 = vadd.f32 %v310_v47, %v69_v46  ;;  %v186_v51 = vld [vmem:[#allocation7 + $0x78] sm:$0xff] }
  0x44   :  { %451 = vmatpush3.bf16.msra.mxu1 %v450_v24  ;;  %v465_v52 = vpack.c.bf16 %v186_v51, %v185_v50  ;;  %v311_v53 = vld [vmem:[%s714_s3] ss:$0 sm:$0xff] }
  0x45   :  { %452 = vmatprep.subr.bf16.mxu1 %v577_v0  ;;  %v312_v57 = vld [vmem:[%s716_s5] ss:$0 sm:$0xff] }
  0x46   :  { %430 = vmatpush3.bf16.msra.mxu0 %v429_v21  ;;  %v313_v6 = vld [vmem:[%s717_s6] ss:$0 sm:$0xff] }
  0x47   :  { %431 = vmatprep.subr.bf16.mxu0 %v577_v0  ;;  %v314_v8 = vld [vmem:[%s718_s7] ss:$0 sm:$0xff] }
  0x48   :  { %454 = vmatpush3.bf16.msra.mxu1 %v453_v30 }
  0x49   :  { %455 = vmatprep.subr.bf16.mxu1 %v577_v0 }
  0x4a   :  { %433 = vmatpush3.bf16.msra.mxu0 %v432_v27 }
  0x4b   :  { %434 = vmatprep.subr.bf16.mxu0 %v577_v0 }
  0x4c   :  { %457 = vmatpush3.bf16.msra.mxu1 %v456_v36 }
  0x4d   :  { %458 = vmatprep.subr.bf16.mxu1 %v577_v0 }
  0x4e   :  { %436 = vmatpush3.bf16.msra.mxu0 %v435_v33 }
  0x4f   :  { %437 = vmatprep.subr.bf16.mxu0 %v577_v0 }
  0x50   :  { %460 = vmatpush3.bf16.msra.mxu1 %v459_v42 }
  0x51   :  { %461 = vmatprep.subr.bf16.mxu1 %v577_v0 }
  0x52   :  { %439 = vmatpush3.bf16.msra.mxu0 %v438_v39 }
  0x53   :  { %440 = vmatprep.subr.bf16.mxu0 %v577_v0 }
  0x54   :  { %463 = vmatpush3.bf16.msra.mxu1 %v462_v48 }
  0x55   :  { %464 = vmatprep.subr.bf16.mxu1 %v577_v0 }
  0x56   :  { %442 = vmatpush3.bf16.msra.mxu0 %v441_v45 }
  0x58   :  { %466 = vmatpush3.bf16.msra.mxu1 %v465_v52 }
  0x59   :  { %382 = vmatmul.mubr.f32.vlgmr.msra.gmra.mrb[0].mxu0 %v77_v49 }
 0x12c   :  { %v167_v54 = vpop.f32.mrb[0].mxu0 }
 0x12d   :  { %v168_v55 = vadd.f32 %v311_v53, %v167_v54  ;;  %v383_v56 = vpop.f32.mrb[1].mxu0 }
 0x12f   :  { %417 = vmatmul.mubr.f32.vlgmr.msra.gmra.mrb[0].mxu1 %v168_v55 }
 0x202   :  { %v260_v58 = vpop.f32.mrb[0].mxu1 }
 0x203   :  { %v261_v59 = vadd.f32 %v312_v57, %v260_v58  ;;  %v418_v60 = vpop.f32.mrb[1].mxu1 }
 0x205   :  { %v264_v61 = vadd.f32 %v261_v59, %v77_v49 }
 0x207   :  { %265 = vadd.xlane.f32.xlu0 %v264_v61 }
 0x294   :  { %v266_v62 = vpop.xlane.xlu0 %265 }
 0x295   :  { %v268_v63 = vmul.f32 0.0078125, %v266_v62 }
 0x297   :  { %v269_v0 = vsub.f32 %v264_v61, %v268_v63 }
 0x299   :  { %v270_v1 = vmul.f32 %v269_v0, %v269_v0 }
 0x29b   :  { %271 = vadd.xlane.f32.xlu0 %v270_v1 }
 0x328   :  { %v272_v2 = vpop.xlane.xlu0 %271 }
 0x329   :  { %v273_v3 = vmul.f32 0.0078125, %v272_v2 }
 0x32b   :  { %v274_v4 = vadd.f32 1e-05, %v273_v3 }
 0x32d   :  { %476 = vrsqrt.f32 %v274_v4 }
 0x337   :  { %v477_v5 = vpop.eup %476 }
 0x338   :  { %v276_v7 = vmul.f32 %v477_v5, %v269_v0 }
 0x33a   :  { %v284_v9 = vmul.f32 %v313_v6, %v276_v7 }
 0x33c   :  { %v292_v10 = vadd.f32 %v314_v8, %v284_v9 }
 0x33e   :  { %293 = vst [vmem:[#allocation8] sm:$0xff] %v292_v10 }
 0x33f   :  { %555 = shalt.err (!%p552_p0)
}
 0x340   :  { %s556_s30 = scalar_lea.hbm %s719_s8, 128 }
 0x341   :  { %p557_p1 = scmp.ne.s32.totalorder %s719_s8, %s556_s30  ;;  %p560_p2 = scmp.lt.u32.totalorder %s556_s30, %s719_s8 }
 0x343   :  { %p562_p3 = pnand %p560_p2, %p557_p1 }
 0x345   :  { %565 = shalt.err (!%p562_p3)
}
 0x346   :  { %303 = dma.vmem_to_hbm [thread:$0]  %s301_s26, 128, %s719_s8, [#allocation4]  }
 0x347   :  { %570 = dma.done.wait [#allocation4], 128  }
 0x348   :  { %571 = vsyncadd [#allocation4], 4294967168 }
 0x349   :  { %307 = vsyncpa [#allocation3], 1 }
 0x34a   :  { %308 = vsyncpa [#allocation6], 1 }
 0x34b   :  { %309 = vsyncpa [#allocation4], 1 }

</bundles_post_ra>
